<compile_context>
chip_gen: v7x
topology: tpu7x:2x2x1
jax: 0.10.0
libtpu: 0.0.40
codegen_flags: <defaults>
</compile_context>

<pallas_src>
import jax
import jax.numpy as jnp
from jax.experimental import pallas as pl
from jax.experimental.pallas import tpu as pltpu


# --------------------------------------------------------------------------
# Kernel body: pure VPU elementwise multiply. The int8->X.dtype mask cast
# rides on idle VALU slots; the kernel is HBM-bandwidth bound on v5e/v6e/v7x.
# --------------------------------------------------------------------------
def _wtgauge_kernel(x_ref, m_ref, o_ref):
    o_ref[...] = x_ref[...] * m_ref[...].astype(x_ref.dtype)


def _sublane_mult(dtype):
    # Native sublane packing multiple: f32 -> 8, bf16 -> 16, int8/bool -> 32.
    itemsize = jnp.dtype(dtype).itemsize
    return max(8, 8 * (4 // max(1, itemsize)))


def _choose_lane_width(n):
    """Widest C in {1024,512,256,128} that divides n (prefer >= 8 rows)."""
    for c in (1024, 512, 256, 128):
        if n % c == 0 and n // c >= 8:
            return c
    for c in (1024, 512, 256, 128):
        if n % c == 0:
            return c
    return None


def _slab_layout(n):
    C = _choose_lane_width(n)
    if C is None:                      # ragged element count: pad the slab
        C = 128
        rows = -(-n // C)
        pad = rows * C - n
    else:
        rows = n // C
        pad = 0
    return C, rows, pad


def _to_slab(a, C, rows, pad):
    a = a.reshape(-1)
    if pad:
        a = jnp.pad(a, (0, pad))
    return a.reshape(rows, C)


def _pick_uniform_tile_rows(rows, sub, tile_r_max, min_steps):
    """Largest tile_r (multiple of `sub`) that divides rows exactly, fits the
    VMEM-derived cap, and yields at least `min_steps` grid steps."""
    if rows % sub != 0:
        return None
    R = rows // sub
    dmax = max(1, tile_r_max // sub)
    best = None
    i = 1
    while i * i <= R:
        if R % i == 0:
            for d in (i, R // i):
                if d <= dmax and R // d >= min_steps and (best is None or d > best):
                    best = d
        i += 1
    return None if best is None else best * sub


def _wtgauge_call(x2, m2, rows, C, x_dtype, *, vmem_budget_bytes, donate_x):
    bx = jnp.dtype(x_dtype).itemsize
    bm = jnp.dtype(m2.dtype).itemsize
    per_elem_bytes = 2 * bx + bm           # X in + out + mask in
    n = rows * C

    sub = max(_sublane_mult(x_dtype), _sublane_mult(m2.dtype))
    tile_r_max = max(sub,
                     (vmem_budget_bytes // (2 * per_elem_bytes * C)) // sub * sub)

    # Feed both v7x TensorCores: require >= 2 grid steps whenever a clean
    # multiple-of-sub split exists; harmless on single-TC v5e/v6e since the
    # per-step overhead (~0.35 us) is negligible at multi-MB tiles.
    min_steps = 2 if rows >= 2 * sub else 1

    tile_r = _pick_uniform_tile_rows(rows, sub, tile_r_max, min_steps)
    if tile_r is not None:
        grid = (rows // tile_r,)           # uniform tiles, no ragged stores
    elif rows <= tile_r_max:
        tile_r = rows                      # whole slab as one full-dim block
        grid = (1,)
    else:
        tile_r = max(sub, (tile_r_max // sub) * sub)
        grid = (pl.cdiv(rows, tile_r),)    # ragged last tile (masked writes)

    cost = pl.CostEstimate(flops=n, transcendentals=0,
                           bytes_accessed=n * per_elem_bytes)

    # TODO(synk): bit-pack the persistent binary mask (8 bits/byte, unpacked
    # on idle VALU slots in-kernel) to cut the mask HBM stream to n/8 bytes.
    return pl.pallas_call(
        _wtgauge_kernel,
        out_shape=jax.ShapeDtypeStruct((rows, C), x_dtype),
        grid_spec=pltpu.PrefetchScalarGridSpec(
            num_scalar_prefetch=0,
            grid=grid,
            in_specs=[
                pl.BlockSpec((tile_r, C), lambda i: (i, 0)),
                pl.BlockSpec((tile_r, C), lambda i: (i, 0)),
            ],
            out_specs=pl.BlockSpec((tile_r, C), lambda i: (i, 0)),
        ),
        compiler_params=pltpu.CompilerParams(
            dimension_semantics=("parallel",),
            # Budget + headroom for Mosaic internal scratch; capped so it also
            # fits v7x's 64 MiB physical VMEM and lifts v5e's 16 MiB default.
            vmem_limit_bytes=min(vmem_budget_bytes + (8 << 20), 48 << 20),
        ),
        cost_estimate=cost,
        input_output_aliases={0: 0} if donate_x else {},
    )(x2, m2)


class WTGauge:
    """JAX/Pallas equivalent of the PyTorch WTGauge module: forward(X) = X * W_mask.

    The gauge mask is a persistent buffer, so the bool->int8 cast and the
    lane-dense slab layout are computed once here (no per-call mask traffic
    beyond the unavoidable read inside the kernel).
    """

    def __init__(self, W_mask, *, vmem_budget_bytes=24 * 1024 * 1024):
        if W_mask.dtype == jnp.bool_:
            W_mask = W_mask.astype(jnp.int8)   # 1-byte stream; cast to X.dtype in-kernel
        self.W_mask = W_mask
        self.vmem_budget_bytes = vmem_budget_bytes
        C, rows, pad = _slab_layout(W_mask.size)
        self._layout = (C, rows, pad)
        self._mask_slab = _to_slab(W_mask, C, rows, pad)

    def __call__(self, X, *, donate_x=False):
        if X.shape == self.W_mask.shape:
            C, rows, pad = self._layout
            m2 = self._mask_slab
        else:
            # TODO(synk): express broadcast dims via the mask BlockSpec
            # index_map (constant block index) instead of materializing.
            mask = jnp.broadcast_to(self.W_mask, X.shape)
            C, rows, pad = _slab_layout(X.size)
            m2 = _to_slab(mask, C, rows, pad)

        x2 = _to_slab(X, C, rows, pad)
        out = _wtgauge_call(x2, m2, rows, C, X.dtype,
                            vmem_budget_bytes=self.vmem_budget_bytes,
                            donate_x=donate_x)
        if pad:
            return out.reshape(-1)[:X.size].reshape(X.shape)
        return out.reshape(X.shape)


if __name__ == "__main__":
    key = jax.random.PRNGKey(0)
    kx, km = jax.random.split(key)

    # Potts-style coupling tensor: (q, q, L, L) with q=4, L=16.
    x_shape = (4, 4, 16, 16)
    X = jax.random.normal(kx, x_shape, dtype=jnp.float32)
    # Binary gauge mask as a bool "registered buffer"; cast cached at init.
    W_mask = jax.random.bernoulli(km, p=0.5, shape=x_shape)

    gauge = WTGauge(W_mask)
    out = gauge(X)
    jax.block_until_ready(out)

    # Correctness check against the trivial reference.
    ref = X * W_mask.astype(X.dtype)
    assert out.shape == ref.shape and out.dtype == ref.dtype
    assert jnp.allclose(out, ref), "mismatch vs reference"
    print("KERNEL_OK")
</pallas_src>

<mosaic_0001>
module attributes {stable_mosaic.version = 11 : i64} {
  func.func @_wtgauge_kernel(%arg0: i32, %arg1: memref<8x512xf32, #tpu.memory_space<vmem>>, %arg2: memref<8x512xi8, #tpu.memory_space<vmem>>, %arg3: memref<8x512xf32, #tpu.memory_space<vmem>>) attributes {dimension_semantics = [#tpu.dimension_semantics<parallel>], iteration_bounds = array<i64: 1>, scalar_prefetch = 0 : i64, scratch_operands = 0 : i64, tpu.core_type = #tpu.core_type<tc>, window_params = [{transform_indices = @transform_0, window_bounds = array<i64: 8, 512>}, {transform_indices = @transform_1, window_bounds = array<i64: 8, 512>}, {transform_indices = @transform_2, window_bounds = array<i64: 8, 512>}]} {
    %c0 = arith.constant 0 : index
    %c0_0 = arith.constant 0 : index
    %0 = vector.load %arg1[%c0, %c0_0] : memref<8x512xf32, #tpu.memory_space<vmem>>, vector<8x512xf32>
    %c0_1 = arith.constant 0 : index
    %c0_2 = arith.constant 0 : index
    %1 = vector.load %arg2[%c0_1, %c0_2] : memref<8x512xi8, #tpu.memory_space<vmem>>, vector<8x512xi8>
    %2 = arith.sitofp %1 : vector<8x512xi8> to vector<8x512xf32>
    %3 = arith.mulf %0, %2 : vector<8x512xf32>
    %c0_3 = arith.constant 0 : index
    %c0_4 = arith.constant 0 : index
    %4 = vector.load %arg3[%c0_3, %c0_4] : memref<8x512xf32, #tpu.memory_space<vmem>>, vector<8x512xf32>
    tpu.vector_store %arg3[%c0_3, %c0_4], %3 {strides = array<i32>} : memref<8x512xf32, #tpu.memory_space<vmem>>, vector<8x512xf32>,
    return
  }
  func.func @transform_0(%arg0: i32) -> (i32, i32) {
    %c0_i32 = arith.constant 0 : i32
    %c0_i32_0 = arith.constant 0 : i32
    return %arg0, %c0_i32 : i32, i32
  }
  func.func @transform_1(%arg0: i32) -> (i32, i32) {
    %c0_i32 = arith.constant 0 : i32
    %c0_i32_0 = arith.constant 0 : i32
    return %arg0, %c0_i32 : i32, i32
  }
  func.func @transform_2(%arg0: i32) -> (i32, i32) {
    %c0_i32 = arith.constant 0 : i32
    %c0_i32_0 = arith.constant 0 : i32
    return %arg0, %c0_i32 : i32, i32
  }
}

</mosaic_0001>

<bundles_post_ra>
// kernel: tpu_custom_call.1
= control target key start
LH: loop header
LB: loop body
LE: loop exit
PB: predicated region body
PF: predicated region fallthrough
CT: control target
= control target key end

     0   :  { %7 = vsyncpa [#allocation3], 0  ;;  %s202_s0 = inlined_call_operand.hbm [shape: f32[8,512], index: 0, kind: input, shape index: {}]   ;;  %s203_s1 = inlined_call_operand.hbm [shape: s8[8,512], index: 1, kind: input, shape index: {}]   ;;  %s204_s2 = inlined_call_operand.hbm [shape: f32[8,512], index: 2, kind: output, shape index: {}]  }
   0x1   :  { %8 = vsyncpa [#allocation6], 0 }
   0x2   :  { %9 = vsyncpa [#allocation4], 0  ;;  %s148_s9 = smov [#allocation2]   ;;  %s149_s11 = smov [#allocation5]  }
   0x3   :  { %s16_s10 = sshll.u32 %s148_s9, 4  ;;  %s26_s12 = sshll.u32 %s149_s11, 4  ;;  %s17_s10 = int_to_ptr.vmem [resolvable:$true] %s16_s10  ;;  %s27_s12 = int_to_ptr.vmem [resolvable:$true] %s26_s12 }
   0x4   :  { %s76_s15 = scalar_lea.hbm %s202_s0, 512 }
   0x5   :  { %p77_p0 = scmp.ne.s32.totalorder %s202_s0, %s76_s15  ;;  %p80_p1 = scmp.lt.u32.totalorder %s76_s15, %s202_s0 }
   0x7   :  { %p82_p2 = pnand %p80_p1, %p77_p0 }
   0x9   :  { %85 = shalt.err (!%p82_p2)
}
   0xa   :  { %s86_s20 = scalar_lea.vmem %s17_s10, 512  ;;  %p91_p4 = scmp.lt.s32.totalorder %s17_s10, %s17_s10 }
   0xb   :  { %p87_p3 = scmp.ne.s32.totalorder %s17_s10, %s86_s20  ;;  %p92_p5 = scmp.lt.s32.totalorder %s86_s20, %s86_s20 }
   0xd   :  { %p93_p6 = por %p92_p5, %p91_p4 }
   0xf   :  { %p94_p7 = pnand %p93_p6, %p87_p3 }
  0x11   :  { %97 = shalt.err (!%p94_p7)
}
  0x12   :  { %19 = dma.hbm_to_vmem [thread:$0]  %s202_s0, 512, %s17_s10, [#allocation3]  }
  0x13   :  { %s98_s25 = scalar_lea.hbm %s203_s1, 128 }
  0x14   :  { %p99_p8 = scmp.ne.s32.totalorder %s203_s1, %s98_s25  ;;  %p102_p9 = scmp.lt.u32.totalorder %s98_s25, %s203_s1 }
  0x16   :  { %p104_p10 = pnand %p102_p9, %p99_p8 }
  0x18   :  { %107 = shalt.err (!%p104_p10)
}
  0x19   :  { %s108_s30 = scalar_lea.vmem %s27_s12, 128  ;;  %p113_p12 = scmp.lt.s32.totalorder %s27_s12, %s27_s12 }
  0x1a   :  { %p109_p11 = scmp.ne.s32.totalorder %s27_s12, %s108_s30  ;;  %p114_p13 = scmp.lt.s32.totalorder %s108_s30, %s108_s30 }
  0x1c   :  { %p115_p0 = por %p114_p13, %p113_p12 }
  0x1e   :  { %p116_p1 = pnand %p115_p0, %p109_p11 }
  0x20   :  { %119 = shalt.err (!%p116_p1)
}
  0x21   :  { %29 = dma.hbm_to_vmem [thread:$0]  %s203_s1, 128, %s27_s12, [#allocation6]  }
  0x22   :  { %142 = dma.done.wait [#allocation3], 512  }
  0x23   :  { %143 = vsyncadd [#allocation3], 4294966784 }
  0x24   :  { %144 = dma.done.wait [#allocation6], 128  }
  0x25   :  { %145 = vsyncadd [#allocation6], 4294967168  ;;  %v40_v0 = vld [vmem:[#allocation5] sm:$0xff]  ;;  %v37_v6 = vld [vmem:[#allocation2 + $0x8] sm:$0xff]  ;;  %s150_s4 = smov [#allocation7]  }
  0x26   :  { %v36_v1 = vld [vmem:[#allocation2] sm:$0xff]  ;;  %v41_v2 = vunpack.c.0.s8 %v40_v0  ;;  %v42_v3 = vunpack.c.1.s8 %v40_v0  ;;  %v43_v4 = vunpack.c.2.s8 %v40_v0  ;;  %v44_v5 = vunpack.c.3.s8 %v40_v0  ;;  %v38_v7 = vld [vmem:[#allocation2 + $0x10] sm:$0xff]  ;;  %v39_v8 = vld [vmem:[#allocation2 + $0x18] sm:$0xff]  ;;  %s63_s5 = sshll.u32 %s150_s4, 4  ;;  %s64_s5 = int_to_ptr.vmem [resolvable:$true] %s63_s5 }
  0x27   :  { %s120_s1 = scalar_lea.vmem %s64_s5, 512  ;;  %p125_p3 = scmp.lt.s32.totalorder %s64_s5, %s64_s5 }
  0x28   :  { %v45_v9 = vcvt.s32.f32 %v41_v2  ;;  %v46_v10 = vcvt.s32.f32 %v42_v3  ;;  %v47_v11 = vcvt.s32.f32 %v43_v4  ;;  %v48_v12 = vcvt.s32.f32 %v44_v5  ;;  %p121_p2 = scmp.ne.s32.totalorder %s64_s5, %s120_s1  ;;  %p126_p4 = scmp.lt.s32.totalorder %s120_s1, %s120_s1 }
  0x2a   :  { %v49_v13 = vmul.f32 %v45_v9, %v36_v1  ;;  %v50_v14 = vmul.f32 %v46_v10, %v37_v6  ;;  %v51_v15 = vmul.f32 %v47_v11, %v38_v7  ;;  %v52_v16 = vmul.f32 %v48_v12, %v39_v8  ;;  %p127_p5 = por %p126_p4, %p125_p3 }
  0x2c   :  { %53 = vst [vmem:[#allocation7] sm:$0xff] %v49_v13  ;;  %54 = vst [vmem:[#allocation7 + $0x8] sm:$0xff] %v50_v14  ;;  %p128_p6 = pnand %p127_p5, %p121_p2 }
  0x2d   :  { %55 = vst [vmem:[#allocation7 + $0x10] sm:$0xff] %v51_v15  ;;  %56 = vst [vmem:[#allocation7 + $0x18] sm:$0xff] %v52_v16 }
  0x2e   :  { %131 = shalt.err (!%p128_p6)
}
  0x2f   :  { %s132_s8 = scalar_lea.hbm %s204_s2, 512 }
  0x30   :  { %p133_p7 = scmp.ne.s32.totalorder %s204_s2, %s132_s8  ;;  %p136_p8 = scmp.lt.u32.totalorder %s132_s8, %s204_s2 }
  0x32   :  { %p138_p9 = pnand %p136_p8, %p133_p7 }
  0x34   :  { %141 = shalt.err (!%p138_p9)
}
  0x35   :  { %66 = dma.vmem_to_hbm [thread:$0]  %s64_s5, 512, %s204_s2, [#allocation4]  }
  0x36   :  { %146 = dma.done.wait [#allocation4], 512  }
  0x37   :  { %147 = vsyncadd [#allocation4], 4294966784 }
  0x38   :  { %70 = vsyncpa [#allocation3], 1 }
  0x39   :  { %71 = vsyncpa [#allocation6], 1 }
  0x3a   :  { %72 = vsyncpa [#allocation4], 1 }

</bundles_post_ra>
